<compile_context>
chip_gen: v5e
topology: v5e:2x2
jax: 0.10.0
libtpu: 0.0.40
codegen_flags: <defaults>
</compile_context>

<pallas_src>
import functools

import jax
import jax.numpy as jnp
from jax import lax
from jax.experimental import pallas as pl
from jax.experimental.pallas import tpu as pltpu


# ----------------------------------------------------------------------------
# Generation-aware budgets (v5e/v6e: 128 MiB VMEM, 1 TC; v7x: 64 MiB, 2 TCs).
# ----------------------------------------------------------------------------
@functools.lru_cache(maxsize=None)
def _tpu_config():
    vmem_bytes = None
    try:
        vmem_bytes = int(pltpu.get_tpu_info().vmem_capacity_bytes)
    except Exception:
        vmem_bytes = None
    kind = ""
    try:
        kind = jax.devices()[0].device_kind.lower()
    except Exception:
        kind = ""
    looks_v7x = any(tag in kind for tag in ("v7", "tpu7", "7x"))
    small_vmem = looks_v7x or (vmem_bytes is not None
                               and vmem_bytes <= 96 * 1024 * 1024)
    if small_vmem:
        # v7x-like: 64 MiB VMEM per TensorCore, two TensorCores -> split conv N
        # so every layer has a parallel grid axis with >= 2 blocks.
        return {"vmem_floor": 32 << 20, "vmem_cap": 48 << 20,
                "split_conv_n": True}
    # v5e / v6e (or detection unavailable): 128 MiB VMEM, single TensorCore.
    return {"vmem_floor": 48 << 20, "vmem_cap": 100 << 20,
            "split_conv_n": False}


def _vmem_limit_bytes(tm, tk, tn, use_acc):
    """Per-call VMEM limit sized from the actual double-buffered blocks."""
    cfg = _tpu_config()
    need = (2 * tm * tk * 2          # x blocks (bf16, double-buffered)
            + 2 * tk * tn * 2        # weight blocks (bf16, double-buffered)
            + 2 * tm * tn * 4        # output blocks (<= f32, double-buffered)
            + 2 * 2 * tn * 4         # scale + shift blocks
            + (tm * tn * 4 if use_acc else 0))   # f32 accumulator scratch
    need = (need * 3) // 2 + (4 << 20)
    return int(max(cfg["vmem_floor"], min(cfg["vmem_cap"], need)))


# ----------------------------------------------------------------------------
# Tiling helpers.
# ----------------------------------------------------------------------------
def _round_up(v, m):
    return ((v + m - 1) // m) * m


def _pick_block(dim, unit, cap):
    """Tile size for a dim of size `dim`: a multiple of `unit`, <= ~cap.

    Prefers (a) one block covering the whole (unit-padded) dim, then
    (b) an exact divisor of the padded dim that is >= cap/2, else
    (c) a near-even split with minimal extra padding.
    """
    cap = max(cap, unit)
    p = _round_up(dim, unit)
    if p <= cap:
        return p
    n_units = p // unit
    max_units = cap // unit
    for d in range(max_units, 0, -1):
        if n_units % d == 0 and d * unit * 2 > cap:
            return d * unit
    nblocks = -(-n_units // max_units)
    return _round_up(-(-p // nblocks), unit)


# ----------------------------------------------------------------------------
# Fused matmul + scale/shift (+ ReLU) Pallas kernels — the hot path.
# ----------------------------------------------------------------------------
def _matmul_bn_relu_kernel(x_ref, w_ref, scale_ref, shift_ref, o_ref, acc_ref,
                           *, apply_relu):
    """K-accumulating variant (grid = (M, N, K), K innermost)."""
    @pl.when(pl.program_id(2) == 0)
    def _():
        acc_ref[...] = jnp.zeros_like(acc_ref)

    # bf16 x bf16 -> f32 accumulation on the MXU.
    acc_ref[...] += jnp.dot(x_ref[...], w_ref[...],
                            preferred_element_type=jnp.float32)

    @pl.when(pl.program_id(2) == pl.num_programs(2) - 1)
    def _():
        y = acc_ref[...] * scale_ref[...] + shift_ref[...]
        if apply_relu:
            y = jnp.maximum(y, 0.0)
        o_ref[...] = y.astype(o_ref.dtype)


def _matmul_bn_relu_kernel_single_k(x_ref, w_ref, scale_ref, shift_ref, o_ref,
                                    *, apply_relu):
    """Single-K-block variant: no accumulator scratch / zero-init / copy."""
    y = jnp.dot(x_ref[...], w_ref[...], preferred_element_type=jnp.float32)
    y = y * scale_ref[...] + shift_ref[...]
    if apply_relu:
        y = jnp.maximum(y, 0.0)
    o_ref[...] = y.astype(o_ref.dtype)


def fused_matmul(x, layer, *, apply_relu, out_dtype=jnp.float32, tm_cap=256):
    """y = relu_opt((x @ w) * scale + shift).

    x: (M, K) any float dtype (cast to bf16 here).
    layer["w"]: (Np//tn, Kp//tk, tk, tn) bf16, tile-major (contiguous DMAs).
    layer["scale"] / ["shift"]: (1, Np) f32.
    Returns (M, layer["n"]) in out_dtype.
    """
    w4 = layer["w"]
    gn, gk, tk, tn = w4.shape
    Kp, Np = gk * tk, gn * tn
    n_out = layer["n"]

    M, K = x.shape
    # tm unit of 16 keeps bf16 blocks aligned to the (16, 128) packed tile.
    tm = _pick_block(M, 16, tm_cap)
    Mp = _round_up(M, tm)

    xp = x.astype(jnp.bfloat16)
    if Mp != M or Kp != K:
        xp = jnp.pad(xp, ((0, Mp - M), (0, Kp - K)))
    gm = Mp // tm

    vmem_limit = _vmem_limit_bytes(tm, tk, tn, use_acc=(gk > 1))

    if gk == 1:
        # Single K block: skip the f32 accumulator scratch entirely.
        grid = (gm, gn)
        kernel = functools.partial(_matmul_bn_relu_kernel_single_k,
                                   apply_relu=apply_relu)
        in_specs = [
            pl.BlockSpec((tm, tk), lambda i, j: (i, 0)),
            pl.BlockSpec((None, None, tk, tn), lambda i, j: (j, 0, 0, 0)),
            pl.BlockSpec((1, tn), lambda i, j: (0, j)),
            pl.BlockSpec((1, tn), lambda i, j: (0, j)),
        ]
        out_specs = pl.BlockSpec((tm, tn), lambda i, j: (i, j))
        scratch_shapes = ()
        dim_sem = ("parallel", "parallel")
    else:
        grid = (gm, gn, gk)
        kernel = functools.partial(_matmul_bn_relu_kernel,
                                   apply_relu=apply_relu)
        in_specs = [
            pl.BlockSpec((tm, tk), lambda i, j, k: (i, k)),
            pl.BlockSpec((None, None, tk, tn), lambda i, j, k: (j, k, 0, 0)),
            pl.BlockSpec((1, tn), lambda i, j, k: (0, j)),
            pl.BlockSpec((1, tn), lambda i, j, k: (0, j)),
        ]
        out_specs = pl.BlockSpec((tm, tn), lambda i, j, k: (i, j))
        scratch_shapes = (pltpu.VMEM((tm, tn), jnp.float32),)
        dim_sem = ("parallel", "parallel", "arbitrary")

    # TODO(synk): pipeline_mode=pl.Buffered(3) on the weight BlockSpec would
    # deepen FC weight pipelining further; kept at default double-buffering.
    out = pl.pallas_call(
        kernel,
        out_shape=jax.ShapeDtypeStruct((Mp, Np), out_dtype),
        grid_spec=pltpu.PrefetchScalarGridSpec(
            num_scalar_prefetch=0,
            grid=grid,
            in_specs=in_specs,
            out_specs=out_specs,
            scratch_shapes=scratch_shapes,
        ),
        compiler_params=pltpu.CompilerParams(
            dimension_semantics=dim_sem,
            vmem_limit_bytes=vmem_limit),
    )(xp, w4, layer["scale"], layer["shift"])

    if Mp != M or Np != n_out:
        out = out[:M, :n_out]
    return out


# ----------------------------------------------------------------------------
# Conv2d + BN + ReLU lowered to im2col + fused Pallas matmul.
# ----------------------------------------------------------------------------
def conv_bn_relu(x_nhwc, layer):
    kh, kw = layer["kh"], layer["kw"]
    stride, padding = layer["stride"], layer["padding"]
    N, H, W, C = x_nhwc.shape

    x = x_nhwc.astype(jnp.bfloat16)        # halve im2col / activation traffic
    Ho = (H + 2 * padding - kh) // stride + 1
    Wo = (W + 2 * padding - kw) // stride + 1

    if layer["patch_mode"] == "cij":
        # Small-C layer (conv1): one fused patch-extraction op instead of a
        # lane-sparse 121-way concat.  K ordering of the last dim is (c, i, j).
        cols = lax.conv_general_dilated_patches(
            x, filter_shape=(kh, kw), window_strides=(stride, stride),
            padding=[(padding, padding), (padding, padding)],
            dimension_numbers=("NHWC", "HWIO", "NHWC"))
        cols = cols.reshape(N * Ho * Wo, C * kh * kw)
    else:
        # Large-C layers: each concat piece is lane-dense (C >= 96); ordering
        # of the im2col K axis is (i, j, c), matching the init-time reshape.
        if padding:
            x = jnp.pad(x, ((0, 0), (padding, padding),
                            (padding, padding), (0, 0)))
        patches = []
        for i in range(kh):
            for j in range(kw):
                patches.append(lax.slice(
                    x,
                    (0, i, j, 0),
                    (N, i + stride * (Ho - 1) + 1,
                     j + stride * (Wo - 1) + 1, C),
                    (1, stride, stride, 1)))
        cols = jnp.concatenate(patches, axis=-1).reshape(N * Ho * Wo,
                                                         kh * kw * C)

    y = fused_matmul(cols, layer, apply_relu=True, out_dtype=jnp.bfloat16)
    return y.reshape(N, Ho, Wo, layer["n"])


def linear(x, layer, apply_relu):
    return fused_matmul(x, layer, apply_relu=apply_relu,
                        out_dtype=jnp.float32)


# ----------------------------------------------------------------------------
# Pooling glue (tiny fraction of total compute).
# TODO(synk): pooling kept as plain-JAX reduce_window glue (matmuls dominate).
# ----------------------------------------------------------------------------
def maxpool3s2(x_nhwc):
    init = jnp.asarray(jnp.finfo(x_nhwc.dtype).min, x_nhwc.dtype)
    return lax.reduce_window(x_nhwc, init, lax.max,
                             (1, 3, 3, 1), (1, 2, 2, 1), 'VALID')


def adaptive_avg_pool(x_nhwc, out_hw=(6, 6)):
    x = x_nhwc.astype(jnp.float32)
    N, H, W, C = x.shape
    oh, ow = out_hw
    hs = [(i * H) // oh for i in range(oh)]
    he = [-(-((i + 1) * H) // oh) for i in range(oh)]
    ws = [(j * W) // ow for j in range(ow)]
    we = [-(-((j + 1) * W) // ow) for j in range(ow)]
    hsz = {e - s for s, e in zip(hs, he)}
    wsz = {e - s for s, e in zip(ws, we)}
    if len(hsz) == 1 and len(wsz) == 1:
        # Uniform bins (covers the 1x1 -> 6x6 broadcast of this config):
        # two gathers + one mean instead of a 36-way unrolled loop.
        kh, kw = hsz.pop(), wsz.pop()
        hidx = jnp.asarray([s + d for s in hs for d in range(kh)], jnp.int32)
        widx = jnp.asarray([s + d for s in ws for d in range(kw)], jnp.int32)
        x = jnp.take(x, hidx, axis=1).reshape(N, oh, kh, W, C)
        x = jnp.take(x, widx, axis=3).reshape(N, oh, kh, ow, kw, C)
        return x.mean(axis=(2, 4))
    # TODO(synk): rare non-uniform-bin shapes fall back to the simple loop.
    rows = []
    for i in range(oh):
        cols = []
        for j in range(ow):
            cols.append(jnp.mean(x[:, hs[i]:he[i], ws[j]:we[j], :],
                                 axis=(1, 2)))
        rows.append(jnp.stack(cols, axis=1))              # (N, ow, C)
    return jnp.stack(rows, axis=1)                        # (N, oh, ow, C)


# ----------------------------------------------------------------------------
# Deterministic parameter initialization (mirrors AlexNet.__init__).
# Weights are converted to matmul layout, cast to bf16, padded and pre-blocked
# into tile-major layout HERE, so the per-forward hot path never touches them.
# ----------------------------------------------------------------------------
def _prep_matmul_weights(wmat, scale, shift, *, tk_cap, tn_cap):
    K, N = wmat.shape
    tk = _pick_block(K, 128, tk_cap)
    tn = _pick_block(N, 128, tn_cap)
    Kp = _round_up(K, tk)
    Np = _round_up(N, tn)
    wp = jnp.pad(wmat, ((0, Kp - K), (0, Np - N))).astype(jnp.bfloat16)
    # Tile-major (Np//tn, Kp//tk, tk, tn): each grid step's weight DMA reads
    # one fully contiguous tile.
    w4 = wp.reshape(Kp // tk, tk, Np // tn, tn).transpose(2, 0, 1, 3)
    sp = jnp.pad(scale.reshape(1, -1).astype(jnp.float32),
                 ((0, 0), (0, Np - N)))
    bp = jnp.pad(shift.reshape(1, -1).astype(jnp.float32),
                 ((0, 0), (0, Np - N)))
    return dict(w=w4, scale=sp, shift=bp, tk=tk, tn=tn, n=N)


def init_params(key, in_channels=3, classes=1000):
    cfg = _tpu_config()
    conv_cfg = [
        # (in_c, out_c, k, stride, padding)
        (in_channels, 96, 11, 4, 0),
        (96, 256, 5, 2, 2),
        (256, 384, 3, 1, 1),
        (384, 384, 3, 1, 1),
        (384, 256, 3, 1, 1),
    ]
    fc_cfg = [(6 * 6 * 256, 4096), (4096, 4096), (4096, classes)]
    keys = jax.random.split(key, len(conv_cfg) + len(fc_cfg))
    eps = 1e-5
    params = {"conv": [], "fc": []}

    # On v7x split conv N into 128-wide blocks so both TensorCores get work;
    # single-TC chips keep one wide block (fewer grid steps).
    conv_tn_cap = 128 if cfg["split_conv_n"] else 512

    for idx, (cin, cout, k, s, p) in enumerate(conv_cfg):
        fan_out = cout * k * k
        std = (2.0 / fan_out) ** 0.5                  # kaiming_normal, fan_out
        w = jax.random.normal(keys[idx], (cout, cin, k, k), jnp.float32) * std
        bias = jnp.zeros((cout,), jnp.float32)        # conv bias init zeros
        gamma = jnp.ones((cout,), jnp.float32)        # BN weight ones
        beta = jnp.zeros((cout,), jnp.float32)        # BN bias zeros
        run_mean = jnp.zeros((cout,), jnp.float32)
        run_var = jnp.ones((cout,), jnp.float32)
        scale = gamma / jnp.sqrt(run_var + eps)       # fold BN (eval mode)
        shift = (bias - run_mean) * scale + beta
        patch_mode = "cij" if cin <= 16 else "ijc"
        if patch_mode == "cij":
            # conv_general_dilated_patches K ordering: (c, i, j).
            wmat = jnp.transpose(w, (1, 2, 3, 0)).reshape(cin * k * k, cout)
        else:
            # slice+concat K ordering: (i, j, c).
            wmat = jnp.transpose(w, (2, 3, 1, 0)).reshape(k * k * cin, cout)
        layer = _prep_matmul_weights(wmat, scale, shift,
                                     tk_cap=2304, tn_cap=conv_tn_cap)
        layer.update(kh=k, kw=k, stride=s, padding=p, patch_mode=patch_mode)
        params["conv"].append(layer)

    for idx, (fin, fout) in enumerate(fc_cfg):
        w = jax.random.normal(keys[len(conv_cfg) + idx],
                              (fout, fin), jnp.float32) * 0.01
        b = jnp.zeros((fout,), jnp.float32)
        ones = jnp.ones((fout,), jnp.float32)
        # Last FC keeps >=2 N-blocks so v7x megacore still has a parallel axis;
        # FC1/FC2 use big (up to 2304x2048) weight tiles to minimize grid steps.
        tn_cap = 512 if idx == len(fc_cfg) - 1 else 2048
        # TODO(synk): int8 (v5e/v6e) / fp8 (v7x) FC weights would halve the
        # dominant HBM weight streaming; skipped to keep f32-faithful math.
        layer = _prep_matmul_weights(w.T, ones, b, tk_cap=2304, tn_cap=tn_cap)
        params["fc"].append(layer)
    return params


# ----------------------------------------------------------------------------
# Forward pass (AlexNet.forward, eval-mode semantics).
# ----------------------------------------------------------------------------
def alexnet_forward(params, x_nchw):
    x = jnp.transpose(x_nchw, (0, 2, 3, 1))           # NCHW -> NHWC
    c = params["conv"]

    x = conv_bn_relu(x, c[0])
    x = maxpool3s2(x)
    x = conv_bn_relu(x, c[1])
    x = maxpool3s2(x)
    x = conv_bn_relu(x, c[2])
    x = conv_bn_relu(x, c[3])
    x = conv_bn_relu(x, c[4])
    x = maxpool3s2(x)
    x = adaptive_avg_pool(x, (6, 6))

    # PyTorch flattens the NCHW tensor (C, H, W order), so transpose back.
    x = jnp.transpose(x, (0, 3, 1, 2)).reshape(x.shape[0], 6 * 6 * 256)

    f = params["fc"]
    # Dropout = identity (eval mode).
    x = linear(x, f[0], apply_relu=True)
    x = linear(x, f[1], apply_relu=True)
    x = linear(x, f[2], apply_relu=False)
    return x


if __name__ == "__main__":
    key = jax.random.PRNGKey(0)
    pkey, xkey = jax.random.split(key)

    params = init_params(pkey, in_channels=3, classes=1000)
    # Smallest "nice" input that survives the stride-4 conv + 3 max-pools:
    # 127 -> 30 -> 14 -> 7 -> 3 -> 3 -> 3 -> 3 -> 1 -> adaptive(6,6)
    x = jax.random.normal(xkey, (2, 3, 127, 127), jnp.float32)

    out = alexnet_forward(params, x)
    out = jax.block_until_ready(out)
    assert out.shape == (2, 1000), out.shape
    assert bool(jnp.all(jnp.isfinite(out)))
    print("KERNEL_OK")
</pallas_src>

<mosaic_0001>
module attributes {stable_mosaic.version = 11 : i64} {
  func.func @_matmul_bn_relu_kernel_single_k(%arg0: i32, %arg1: i32, %arg2: memref<240x384xbf16, #tpu.memory_space<vmem>>, %arg3: memref<1x1x384x128xbf16, #tpu.memory_space<vmem>>, %arg4: memref<1x128xf32, #tpu.memory_space<vmem>>, %arg5: memref<1x128xf32, #tpu.memory_space<vmem>>, %arg6: memref<240x128xbf16, #tpu.memory_space<vmem>>) attributes {dimension_semantics = [#tpu.dimension_semantics<parallel>, #tpu.dimension_semantics<parallel>], iteration_bounds = array<i64: 8, 1>, scalar_prefetch = 0 : i64, scratch_operands = 0 : i64, tpu.core_type = #tpu.core_type<tc>, window_params = [{transform_indices = @transform_0, window_bounds = array<i64: 240, 384>}, {transform_indices = @transform_1, window_bounds = array<i64: 1, 1, 384, 128>}, {transform_indices = @transform_2, window_bounds = array<i64: 1, 128>}, {transform_indices = @transform_3, window_bounds = array<i64: 1, 128>}, {transform_indices = @transform_4, window_bounds = array<i64: 240, 128>}]} {
    %c0 = arith.constant 0 : index
    %c0_0 = arith.constant 0 : index
    %0 = vector.load %arg2[%c0, %c0_0] : memref<240x384xbf16, #tpu.memory_space<vmem>>, vector<240x384xbf16>
    %c0_1 = arith.constant 0 : index
    %c0_2 = arith.constant 0 : index
    %c0_3 = arith.constant 0 : index
    %c0_4 = arith.constant 0 : index
    %1 = vector.load %arg3[%c0_1, %c0_2, %c0_3, %c0_4] : memref<1x1x384x128xbf16, #tpu.memory_space<vmem>>, vector<1x1x384x128xbf16>
    %2 = vector.shape_cast %1 : vector<1x1x384x128xbf16> to vector<384x128xbf16>
    %cst = arith.constant dense<0.000000e+00> : vector<240x128xf32>
    %3 = tpu.matmul %0, %2, %cst {dimension_numbers = #tpu.dot_dimension_numbers<[1], [0], [0], [1], [0, 0, 1, 1], [], []>} : vector<240x384xbf16>, vector<384x128xbf16>, vector<240x128xf32> -> vector<240x128xf32>
    %c0_5 = arith.constant 0 : index
    %c0_6 = arith.constant 0 : index
    %4 = vector.load %arg4[%c0_5, %c0_6] : memref<1x128xf32, #tpu.memory_space<vmem>>, vector<1x128xf32>
    %5 = vector.broadcast %4 : vector<1x128xf32> to vector<240x128xf32>
    %6 = arith.mulf %3, %5 : vector<240x128xf32>
    %c0_7 = arith.constant 0 : index
    %c0_8 = arith.constant 0 : index
    %7 = vector.load %arg5[%c0_7, %c0_8] : memref<1x128xf32, #tpu.memory_space<vmem>>, vector<1x128xf32>
    %8 = vector.broadcast %7 : vector<1x128xf32> to vector<240x128xf32>
    %9 = arith.addf %6, %8 : vector<240x128xf32>
    %cst_9 = arith.constant 0.000000e+00 : f32
    %10 = vector.broadcast %cst_9 : f32 to vector<240x128xf32>
    %11 = arith.maximumf %9, %10 : vector<240x128xf32>
    %12 = arith.truncf %11 : vector<240x128xf32> to vector<240x128xbf16>
    %c0_10 = arith.constant 0 : index
    %c0_11 = arith.constant 0 : index
    %13 = vector.load %arg6[%c0_10, %c0_11] : memref<240x128xbf16, #tpu.memory_space<vmem>>, vector<240x128xbf16>
    tpu.vector_store %arg6[%c0_10, %c0_11], %12 {strides = array<i32>} : memref<240x128xbf16, #tpu.memory_space<vmem>>, vector<240x128xbf16>,
    return
  }
  func.func @transform_0(%arg0: i32, %arg1: i32) -> (i32, i32) {
    %c0_i32 = arith.constant 0 : i32
    %c0_i32_0 = arith.constant 0 : i32
    return %arg0, %c0_i32 : i32, i32
  }
  func.func @transform_1(%arg0: i32, %arg1: i32) -> (i32, i32, i32, i32) {
    %c0_i32 = arith.constant 0 : i32
    %c0_i32_0 = arith.constant 0 : i32
    %c0_i32_1 = arith.constant 0 : i32
    %c0_i32_2 = arith.constant 0 : i32
    return %arg1, %c0_i32, %c0_i32_0, %c0_i32_1 : i32, i32, i32, i32
  }
  func.func @transform_2(%arg0: i32, %arg1: i32) -> (i32, i32) {
    %c0_i32 = arith.constant 0 : i32
    %c0_i32_0 = arith.constant 0 : i32
    return %c0_i32, %arg1 : i32, i32
  }
  func.func @transform_3(%arg0: i32, %arg1: i32) -> (i32, i32) {
    %c0_i32 = arith.constant 0 : i32
    %c0_i32_0 = arith.constant 0 : i32
    return %c0_i32, %arg1 : i32, i32
  }
  func.func @transform_4(%arg0: i32, %arg1: i32) -> (i32, i32) {
    %c0_i32 = arith.constant 0 : i32
    return %arg0, %arg1 : i32, i32
  }
}

</mosaic_0001>

<bundles_post_ra>
// kernel: tpu_custom_call.1
= control target key start
LH: loop header
LB: loop body
LE: loop exit
PB: predicated region body
PF: predicated region fallthrough
CT: control target
= control target key end

     0   :  { %s2568_s0 = inlined_call_operand.hbm [shape: bf16[1920,384], index: 0, kind: input, shape index: {}]   ;;  %s2569_s1 = inlined_call_operand.hbm [shape: bf16[1,1,384,128], index: 1, kind: input, shape index: {}]   ;;  %s2570_s2 = inlined_call_operand.hbm [shape: f32[1,128], index: 2, kind: input, shape index: {}]   ;;  %s2571_s3 = inlined_call_operand.hbm [shape: f32[1,128], index: 3, kind: input, shape index: {}]   ;;  %s2572_s4 = inlined_call_operand.hbm [shape: bf16[1920,128], index: 4, kind: output, shape index: {}]  }
   0x1   :  { %2573 = sst [smem:[#allocation15_spill]] %s2569_s1 }
   0x2   :  { %9 = vsyncpa [#allocation3], 0 }
   0x3   :  { %11 = vsyncpa [#allocation3 + $0x1], 0 }
   0x4   :  { %12 = vsyncpa [#allocation6], 0 }
   0x5   :  { %13 = vsyncpa [#allocation9], 0 }
   0x6   :  { %14 = vsyncpa [#allocation4], 0 }
   0x7   :  { %16 = vsyncpa [#allocation4 + $0x1], 0  ;;  %s2162_s15 = smov 0   ;;  %s2164_s16 = smov 0  }
   0x8   :  { %s2166_s17 = smov 0   ;;  %s2168_s18 = smov 0  }
   0x9   :  { %s2170_s19 = smov 0   ;;  %s2172_s20 = smov 0  }
   0xa LB: > { %s1336_s21 = sadd.s32 4294967295, %s2126_s20   ;;  %s1337_s22 = sadd.s32 4294967294, %s2126_s20   ;;  %s2126_s20 = sphi %s2172_s20, %s22_s20   ;;  %s2122_s19 = sphi %s2170_s19, %s2586_s19   ;;  %s2118_s18 = sphi %s2168_s18, %s2585_s18   ;;  %s2114_s17 = sphi %s2166_s17, %s2584_s17   ;;  %s2110_s16 = sphi %s2164_s16, %s2583_s16   ;;  %s2106_s15 = sphi %s2162_s15, %s2582_s15  }
   0xb   : > { %p54_p0 = scmp.ne.s32.totalorder %s2110_s16, %s2106_s15  ;;  %p2196_p1 = scmp.eq.s32.totalorder %s1336_s21, 0 }
   0xc   : > { %p2200_p2 = scmp.eq.s32.totalorder %s1336_s21, 7  ;;  %p164_p3 = scmp.eq.s32.totalorder %s1337_s22, 7 }
   0xd   : > { %p2206_p4 = por %p2196_p1, %p54_p0  ;;  %p1338_p5 = scmp.ge.s32.totalorder %s2126_s20, 1 }
   0xe   : > { %p2211_p6 = por %p164_p3, %p54_p0  ;;  %p171_p7 = scmp.lt.s32.totalorder %s2126_s20, 9 }
   0xf   : > { %s2578_s1 = sld [smem:[#allocation15_spill]]  ;;  %s2128_s5 = smov [#allocation5]  }
  0x10   : > { %p2219_p8 = pnand %p1338_p5, %p171_p7  ;;  %s187_s6 = sshll.u32 %s2128_s5, 4  ;;  %s188_s6 = int_to_ptr.vmem [resolvable:$true] %s187_s6 }
  0x11   : > { %s201_s10 = sshll.u32 %s2570_s2, 4  ;;  %s2129_s11 = smov 64   ;;  %s202_s10 = int_to_ptr.hbm [resolvable:$true] %s201_s10 }
  0x12   : > { %p1830_p9 = pneg %p2219_p8  ;;  %s2130_s12 = smov 4  }
  0x13   : > { %s2131_s13 = smov [#allocation7]   ;;  %s214_s27 = sshll.u32 %s2571_s3, 4  ;;  %s215_s27 = int_to_ptr.hbm [resolvable:$true] %s214_s27 }
  0x14   : > { %p2227_p10 = pnand %p1830_p9, %p2196_p1  ;;  %s203_s14 = sshll.u32 %s2131_s13, 4  ;;  %s204_s14 = int_to_ptr.vmem [resolvable:$true] %s203_s14 }
  0x15   : > { %s185_s29 = sshll.u32 %s2578_s1, 4  ;;  %s2132_s28 = smov [#allocation8]   ;;  %s186_s29 = int_to_ptr.hbm [resolvable:$true] %s185_s29 }
  0x16   : > { %1833 = dma.hbm_to_vmem [thread:$0]  (!%p2227_p10), %s186_s29, 3072, %s188_s6, [#allocation6], %s2129_s11, %s2129_s11, %s2130_s12  }
  0x17   : > { %1836 = dma.hbm_to_vmem [thread:$0]  (!%p2227_p10), %s202_s10, 16, %s204_s14, [#allocation6]  }
  0x18   : > { %s216_s5 = sshll.u32 %s2132_s28, 4  ;;  %s34_s29 = sadd.s32 1, %s2122_s19  ;;  %s217_s5 = int_to_ptr.vmem [resolvable:$true] %s216_s5 }
  0x19   : > { %1839 = dma.hbm_to_vmem [thread:$0]  (!%p2227_p10), %s215_s27, 16, %s217_s5, [#allocation9]  }
  0x1a   : > { %p36_p11 = scmp.ge.s32.totalorder %s34_s29, 8  ;;  %s41_s6 = sadd.s32 1, %s2114_s17 }
  0x1b   : > { %p48_p12 = scmp.ne.s32.totalorder %s2114_s17, %s2110_s16  ;;  %p49_p13 = scmp.eq.s32.totalorder %s2126_s20, 0 }
  0x1c   : > { %s2588_s29 = smov (%p36_p11, %s34_s29), 0  ;;  %p1851_p5 = scmp.lt.s32.totalorder %s2126_s20, 8 }
  0x1d   : > { %p50_p0 = por %p49_p13, %p48_p12  ;;  %p2252_p3 = por %p2200_p2, %p48_p12 }
  0x1e   : > { %s38_s9 = ssub.s32 %s2122_s19, %s2588_s29  ;;  %s227_s7 = sand.u32 1, %s2114_s17  }
  0x1f   : > { %p39_p7 = scmp.eq.s32.totalorder %s38_s9, 0  ;;  %s1810_s10 = smul.u32 360, %s227_s7 }
  0x20   : > { %s1852_s12 = smul.u32 360, %s2122_s19  ;;  %p1841_p9 = pnand %p1851_p5, %p50_p0 }
  0x21   : > { %s2261_s11 = scalar_select %p39_p7, %s2114_s17, %s41_s6  }
  0x22   : > { %s231_s13 = scalar_lea.vmem [#allocation2], %s1810_s10  ;;  %s237_s24 = scalar_lea.hbm %s2568_s0, %s1852_s12 }
  0x23   : > { %s240_s14 = sshll.u32 %s231_s13, 4  ;;  %s238_s27 = sshll.u32 %s237_s24, 4  ;;  %s241_s14 = int_to_ptr.vmem [resolvable:$true] %s240_s14  ;;  %s239_s27 = int_to_ptr.hbm [resolvable:$true] %s238_s27 }
  0x24   : > { %s228_s28 = scalar_lea.sflag [#allocation3], %s227_s7  ;;  %s2133_s5 = smov 192  }
  0x25   : > { %s2134_s1 = smov 12   ;;  %252 = sbr.rel (%p2219_p8) target bundleno = 412 (0x19c), region = 36 }
  0x26   : > { %1843 = dma.hbm_to_vmem [thread:$0]  (!%p1841_p9), %s239_s27, 5760, %s241_s14, %s228_s28, %s2133_s5, %s2133_s5, %s2134_s1  }
  0x27   : > { %s2270_s6 = sand.u32 (!%p2219_p8), 1, %s2110_s16  }
  0x28   : > { %s1812_s9 = smul.u32 (!%p2219_p8), 360, %s2270_s6  ;;  %s255_s10 = scalar_lea.sflag (!%p2219_p8), [#allocation3], %s2270_s6 }
  0x2a   : > { %s2274_s13 = scalar_lea.vmem [#allocation2], %s1812_s9 }
  0x2b   : > { %2089 = dma.done.wait (%p2206_p4), %s255_s10, 5760  }
  0x2c   : > { %2091 = vsyncadd (%p2206_p4), %s255_s10, 4294961536 }
  0x2d   : > { %2093 = dma.done.wait (%p2196_p1), [#allocation6], 3088  }
  0x2e   : > { %2095 = vsyncadd (%p2196_p1), [#allocation6], 4294964208 }
  0x2f   : > { %2097 = dma.done.wait (%p2196_p1), [#allocation9], 16  }
  0x30   : > { %2099 = vsyncadd (%p2196_p1), [#allocation9], 4294967280  ;;  %v1679_v0 = vld [vmem:[#allocation5 + $0x38] sm:$0xff]  ;;  %v1678_v3 = vld [vmem:[#allocation5 + $0x30] sm:$0xff]  ;;  %s1813_s1 = smul.u32 120, %s2270_s6  ;;  %s1204_s21 = scalar_lea.sflag [#allocation4], %s2270_s6 }
  0x31   : > { %v2288_v1 = vld [vmem:[#allocation5 + $0x78] sm:$0xff]  ;;  %793 = vmatpush.bf16.msra.mxu0 %v1679_v0  ;;  %1786 = vmatpush.bf16.msra.mxu3 %v1679_v0  ;;  %v2294_v4 = vld [vmem:[#allocation5 + $0x70] sm:$0xff]  ;;  %v1677_v6 = vld [vmem:[#allocation5 + $0x28] sm:$0xff]  ;;  %s1696_s25 = smul.u32 120, %s2118_s18  ;;  %s2056_s5 = scalar_lea.hbm %s2572_s4, 960 }
  0x32   : > { %v2290_v2 = vld [vmem:[#allocation5 + $0xb8] sm:$0xff]  ;;  %877 = vmatpush.bf16.msra.mxu1 %v2288_v1  ;;  %v2296_v5 = vld [vmem:[#allocation5 + $0xb0] sm:$0xff]  ;;  %v1685_v7 = vld [vmem:[#allocation5 + $0x68] sm:$0xff]  ;;  %s2421_s23 = scalar_lea.vmem [#allocation10], %s1813_s1 }
  0x33   : > { %961 = vmatpush.bf16.msra.mxu2 %v2290_v2  ;;  %v2300_v8 = vld [vmem:[#allocation5 + $0xa8] sm:$0xff]  ;;  %v1676_v9 = vld [vmem:[#allocation5 + $0x20] sm:$0xff]  ;;  %v1675_v12 = vld [vmem:[#allocation5 + $0x18] sm:$0xff]  ;;  %s1216_s12 = scalar_lea.hbm %s2572_s4, %s1696_s25  ;;  %s1217_s14 = sshll.u32 %s2421_s23, 4  ;;  %s1218_s14 = int_to_ptr.vmem [resolvable:$true] %s1217_s14 }
  0x34   : > { %v1684_v10 = vld [vmem:[#allocation5 + $0x60] sm:$0xff]  ;;  %v1683_v13 = vld [vmem:[#allocation5 + $0x58] sm:$0xff]  ;;  %v1674_v15 = vld [vmem:[#allocation5 + $0x10] sm:$0xff]  ;;  %s1219_s18 = sshll.u32 %s1216_s12, 4  ;;  %s1220_s18 = int_to_ptr.hbm [resolvable:$true] %s1219_s18 }
  0x35   : > { %794 = vmatpush.bf16.msra.mxu0 %v1678_v3  ;;  %1787 = vmatpush.bf16.msra.mxu3 %v1678_v3  ;;  %v2303_v11 = vld [vmem:[#allocation5 + $0xa0] sm:$0xff]  ;;  %v2306_v14 = vld [vmem:[#allocation5 + $0x98] sm:$0xff]  ;;  %v1682_v16 = vld [vmem:[#allocation5 + $0x50] sm:$0xff]  ;;  %s2050_s22 = sshra.s32 %s1220_s18, 4  ;;  %s2051_s22 = int_to_ptr.hbm [resolvable:$true] %s2050_s22 }
  0x36   : > { %878 = vmatpush.bf16.msra.mxu1 %v2294_v4  ;;  %v2309_v17 = vld [vmem:[#allocation5 + $0x90] sm:$0xff]  ;;  %v1673_v18 = vld [vmem:[#allocation5 + $0x8] sm:$0xff]  ;;  %v1672_v21 = vld [vmem:[#allocation5] sm:$0xff]  ;;  %s2052_s24 = scalar_lea.hbm %s2051_s22, 120  ;;  %p2057_p8 = scmp.lt.s32.totalorder %s2051_s22, %s2572_s4 }
  0x37   : > { %962 = vmatpush.bf16.msra.mxu2 %v2296_v5  ;;  %v1681_v19 = vld [vmem:[#allocation5 + $0x48] sm:$0xff]  ;;  %v1680_v22 = vld [vmem:[#allocation5 + $0x40] sm:$0xff]  ;;  %v1350_v24 = vld [vmem:[%s2274_s13] sm:$0xf]  ;;  %p2053_p1 = scmp.ne.s32.totalorder %s2051_s22, %s2052_s24  ;;  %p2058_p10 = scmp.lt.s32.totalorder %s2056_s5, %s2052_s24 }
  0x38   : > { %v2312_v20 = vld [vmem:[#allocation5 + $0x88] sm:$0xff]  ;;  %v2314_v23 = vld [vmem:[#allocation5 + $0x80] sm:$0xff]  ;;  %v1494_v26 = vld [vmem:[%s2274_s13 + $0x120] sm:$0xf] }
  0x39   : > { %795 = vmatpush.bf16.msra.mxu0 %v1677_v6  ;;  %1788 = vmatpush.bf16.msra.mxu3 %v1677_v6  ;;  %v1628_v25 = vld [vmem:[%s2274_s13 + $0x8] sm:$0xf0]  ;;  %v1627_v28 = vld [vmem:[%s2274_s13 + $0x4] sm:$0xf]  ;;  %v1352_v29 = vld [vmem:[%s2274_s13 + $0xc] sm:$0xf0]  ;;  %p2054_p2 = pnand %p2053_p1, %p2252_p3  ;;  %p2059_p11 = por %p2058_p10, %p2057_p8 }
  0x3a   : > { %879 = vmatpush.bf16.msra.mxu1 %v1685_v7  ;;  %v1664_v27 = vld [vmem:[%s2274_s13 + $0x128] sm:$0xf0]  ;;  %v1358_v30 = vld [vmem:[%s2274_s13 + $0x8] sm:$0xf]  ;;  %v1629_v31 = vld [vmem:[%s2274_s13 + $0x10] sm:$0xf0]  ;;  %v1351_v32 = vor.u32 %v1628_v25, %v1350_v24  ;;  %v1355_v34 = vor.u32 %v1627_v28, %v1352_v29 }
  0x3b   : > { %963 = vmatpush.bf16.msra.mxu2 %v2300_v8  ;;  %v1495_v33 = vor.u32 %v1664_v27, %v1494_v26  ;;  %v1359_v35 = vor.u32 %v1629_v31, %v1358_v30  ;;  %v1362_v36 = vld [vmem:[%s2274_s13 + $0x18] sm:$0xf]  ;;  %v1631_v37 = vld [vmem:[%s2274_s13 + $0x20] sm:$0xf0]  ;;  %v1630_v40 = vld [vmem:[%s2274_s13 + $0x1c] sm:$0xf]  ;;  %p2055_p4 = pneg %p2054_p2 }
  0x3c   : > { %v1506_v38 = vld [vmem:[%s2274_s13 + $0x138] sm:$0xf]  ;;  %v1667_v39 = vld [vmem:[%s2274_s13 + $0x140] sm:$0xf0]  ;;  %v1364_v41 = vld [vmem:[%s2274_s13 + $0x24] sm:$0xf0]  ;;  %v1363_v44 = vor.u32 %v1631_v37, %v1362_v36 }
  0x3d   : > { %796 = vmatpush.bf16.msra.mxu0 %v1676_v9  ;;  %1789 = vmatpush.bf16.msra.mxu3 %v1676_v9  ;;  %v1370_v42 = vld [vmem:[%s2274_s13 + $0x20] sm:$0xf]  ;;  %v1632_v43 = vld [vmem:[%s2274_s13 + $0x28] sm:$0xf0]  ;;  %v1507_v45 = vor.u32 %v1667_v39, %v1506_v38  ;;  %v1367_v46 = vor.u32 %v1630_v40, %v1364_v41  ;;  %v1374_v48 = vld [vmem:[%s2274_s13 + $0x30] sm:$0xf]  ;;  %p2060_p12 = pnand %p2059_p11, %p2055_p4 }
  0x3e   : > { %880 = vmatpush.bf16.msra.mxu1 %v1684_v10  ;;  %v1371_v47 = vor.u32 %v1632_v43, %v1370_v42  ;;  %v1634_v49 = vld [vmem:[%s2274_s13 + $0x38] sm:$0xf0]  ;;  %v1518_v50 = vld [vmem:[%s2274_s13 + $0x150] sm:$0xf]  ;;  %v1633_v52 = vld [vmem:[%s2274_s13 + $0x34] sm:$0xf] }
  0x3f   : > { %964 = vmatpush.bf16.msra.mxu2 %v2303_v11  ;;  %v1670_v51 = vld [vmem:[%s2274_s13 + $0x158] sm:$0xf0]  ;;  %v1376_v53 = vld [vmem:[%s2274_s13 + $0x3c] sm:$0xf0]  ;;  %v1382_v54 = vld [vmem:[%s2274_s13 + $0x38] sm:$0xf]  ;;  %v1375_v56 = vor.u32 %v1634_v49, %v1374_v48 }
  0x40   : > { %v1635_v55 = vld [vmem:[%s2274_s13 + $0x40] sm:$0xf0]  ;;  %v1519_v57 = vor.u32 %v1670_v51, %v1518_v50  ;;  %v1379_v58 = vor.u32 %v1633_v52, %v1376_v53  ;;  %v1386_v60 = vld [vmem:[%s2274_s13 + $0x48] sm:$0xf]  ;;  %v1637_v61 = vld [vmem:[%s2274_s13 + $0x50] sm:$0xf0] }
  0x41   : > { %797 = vmatpush.bf16.msra.mxu0 %v1675_v12  ;;  %1790 = vmatpush.bf16.msra.mxu3 %v1675_v12  ;;  %v1383_v59 = vor.u32 %v1635_v55, %v1382_v54  ;;  %v1636_v62 = vld [vmem:[%s2274_s13 + $0x4c] sm:$0xf]  ;;  %v1663_v63 = vld [vmem:[%s2274_s13 + $0x124] sm:$0xf]  ;;  %v1496_v0 = vld [vmem:[%s2274_s13 + $0x12c] sm:$0xf0] }
  0x42   : > { %881 = vmatpush.bf16.msra.mxu1 %v1683_v13  ;;  %v1638_v3 = vld [vmem:[%s2274_s13 + $0x58] sm:$0xf0]  ;;  %v1640_v9 = vld [vmem:[%s2274_s13 + $0x68] sm:$0xf0]  ;;  %v1508_v12 = vld [vmem:[%s2274_s13 + $0x144] sm:$0xf0] }
  0x43   : > { %965 = vmatpush.bf16.msra.mxu2 %v2306_v14  ;;  %v1669_v24 = vld [vmem:[%s2274_s13 + $0x154] sm:$0xf]  ;;  %v1520_v25 = vld [vmem:[%s2274_s13 + $0x15c] sm:$0xf0]  ;;  %v1644_v27 = vld [vmem:[%s2274_s13 + $0x88] sm:$0xf0] }
  0x44   : > { %v1418_v26 = vld [vmem:[%s2274_s13 + $0x80] sm:$0xf]  ;;  %v1523_v29 = vor.u32 %v1669_v24, %v1520_v25  ;;  %v1665_v36 = vld [vmem:[%s2274_s13 + $0x130] sm:$0xf0]  ;;  %v1430_v38 = vld [vmem:[%s2274_s13 + $0x98] sm:$0xf] }
  0x45   : > { %798 = vmatpush.bf16.msra.mxu0 %v1674_v15  ;;  %1791 = vmatpush.bf16.msra.mxu3 %v1674_v15  ;;  %v1641_v15 = vld [vmem:[%s2274_s13 + $0x70] sm:$0xf0]  ;;  %v1419_v31 = vor.u32 %v1644_v27, %v1418_v26  ;;  %v1424_v37 = vld [vmem:[%s2274_s13 + $0x9c] sm:$0xf0]  ;;  %v1647_v39 = vld [vmem:[%s2274_s13 + $0xa0] sm:$0xf0] }
  0x46   : > { %882 = vmatpush.bf16.msra.mxu1 %v1682_v16  ;;  %v1431_v43 = vor.u32 %v1647_v39, %v1430_v38  ;;  %v1668_v48 = vld [vmem:[%s2274_s13 + $0x148] sm:$0xf0]  ;;  %v1436_v49 = vld [vmem:[%s2274_s13 + $0xb4] sm:$0xf0]  ;;  %v1442_v50 = vld [vmem:[%s2274_s13 + $0xb0] sm:$0xf] }
  0x47   : > { %966 = vmatpush.bf16.msra.mxu2 %v2309_v17  ;;  %v1650_v51 = vld [vmem:[%s2274_s13 + $0xb8] sm:$0xf0] }
  0x48   : > { %v1443_v55 = vor.u32 %v1650_v51, %v1442_v50 }
  0x49   : > { %799 = vmatpush.bf16.msra.mxu0 %v1673_v18  ;;  %1792 = vmatpush.bf16.msra.mxu3 %v1673_v18 }
  0x4a   : > { %883 = vmatpush.bf16.msra.mxu1 %v1681_v19 }
  0x4b   : > { %967 = vmatpush.bf16.msra.mxu2 %v2312_v20 }
  0x4d   : > { %800 = vmatpush.bf16.msra.mxu0 %v1672_v21  ;;  %1793 = vmatpush.bf16.msra.mxu3 %v1672_v21  ;;  %v1643_v21 = vld [vmem:[%s2274_s13 + $0x80] sm:$0xf0] }
  0x4e   : > { %884 = vmatpush.bf16.msra.mxu1 %v1680_v22 }
  0x4f   : > { %968 = vmatpush.bf16.msra.mxu2 %v2314_v23 }
  0x50   : > { %801 = vmatmul.bf16.vlgmr.msra.gmra.mxu0 %v1351_v32  ;;  %861 = vmatmul.bf16.vlgmr.msra.gmra.mxu3 %v1495_v33  ;;  %v1422_v32 = vld [vmem:[%s2274_s13 + $0x90] sm:$0xf]  ;;  %v1646_v33 = vld [vmem:[%s2274_s13 + $0x98] sm:$0xf0] }
  0x51   : > { %1794 = vmatpush.bf16.msrb.mxu3 %v2288_v1  ;;  %885 = vmatmul.bf16.vlgmr.msra.gmra.mxu1 %v1355_v34  ;;  %v1388_v1 = vld [vmem:[%s2274_s13 + $0x54] sm:$0xf0]  ;;  %v1645_v34 = vld [vmem:[%s2274_s13 + $0x94] sm:$0xf]  ;;  %v1423_v40 = vor.u32 %v1646_v33, %v1422_v32 }
  0x52   : > { %969 = vmatmul.bf16.vlgmr.msra.gmra.mxu2 %v1359_v35  ;;  %v1391_v6 = vor.u32 %v1636_v62, %v1388_v1  ;;  %v1502_v35 = vld [vmem:[%s2274_s13 + $0x128] sm:$0xf]  ;;  %v1427_v42 = vor.u32 %v1645_v34, %v1424_v37 }
  0x53   : > { %v1503_v41 = vor.u32 %v1665_v36, %v1502_v35  ;;  %v1454_v62 = vld [vmem:[%s2274_s13 + $0xc8] sm:$0xf] }
  0x55   : > { %1795 = vmatpush.bf16.msrb.mxu3 %v2294_v4  ;;  %v1387_v4 = vor.u32 %v1637_v61, %v1386_v60  ;;  %v1671_v60 = vld [vmem:[%s2274_s13 + $0x160] sm:$0xf0]  ;;  %v1448_v61 = vld [vmem:[%s2274_s13 + $0xcc] sm:$0xf0] }
  0x59   : > { %1796 = vmatpush.bf16.msrb.mxu3 %v1685_v7 }
  0x5d   : > { %1797 = vmatpush.bf16.msrb.mxu3 %v1684_v10  ;;  %v1639_v10 = vld [vmem:[%s2274_s13 + $0x64] sm:$0xf] }
  0x60   : > { %806 = vmatmul.bf16.gmra.mxu0 %v1363_v44  ;;  %866 = vmatmul.bf16.gmra.mxu3 %v1507_v45  ;;  %v1434_v44 = vld [vmem:[%s2274_s13 + $0xa8] sm:$0xf]  ;;  %v1649_v45 = vld [vmem:[%s2274_s13 + $0xb0] sm:$0xf0] }
  0x61   : > { %1798 = vmatpush.bf16.msrb.mxu3 %v1683_v13  ;;  %890 = vmatmul.bf16.gmra.mxu1 %v1367_v46  ;;  %v1400_v13 = vld [vmem:[%s2274_s13 + $0x6c] sm:$0xf0]  ;;  %v1648_v46 = vld [vmem:[%s2274_s13 + $0xac] sm:$0xf]  ;;  %v1435_v52 = vor.u32 %v1649_v45, %v1434_v44  ;;  %v1657_v44 = vld [vmem:[%s2274_s13 + $0xf4] sm:$0xf] }
  0x62   : > { %974 = vmatmul.bf16.gmra.mxu2 %v1371_v47  ;;  %v1403_v18 = vor.u32 %v1639_v10, %v1400_v13  ;;  %v1514_v47 = vld [vmem:[%s2274_s13 + $0x140] sm:$0xf]  ;;  %v1439_v54 = vor.u32 %v1648_v46, %v1436_v49  ;;  %v1458_v13 = vld [vmem:[%s2274_s13 + $0xd8] sm:$0xf] }
  0x63   : > { %v1515_v53 = vor.u32 %v1668_v48, %v1514_v47  ;;  %v1472_v45 = vld [vmem:[%s2274_s13 + $0xfc] sm:$0xf0]  ;;  %v1478_v46 = vld [vmem:[%s2274_s13 + $0xf8] sm:$0xf]  ;;  %v1659_v47 = vld [vmem:[%s2274_s13 + $0x100] sm:$0xf0] }
  0x65   : > { %1799 = vmatpush.bf16.msrb.mxu3 %v1682_v16 }
  0x69   : > { %1800 = vmatpush.bf16.msrb.mxu3 %v1681_v19 }
  0x6d   : > { %1801 = vmatpush.bf16.msrb.mxu3 %v1680_v22  ;;  %v1642_v22 = vld [vmem:[%s2274_s13 + $0x7c] sm:$0xf] }
  0x70   : > { %811 = vmatmul.bf16.gmra.mxu0 %v1375_v56  ;;  %871 = vmatmul.bf16.gmra.mxu3 %v1519_v57  ;;  %v1446_v56 = vld [vmem:[%s2274_s13 + $0xc0] sm:$0xf]  ;;  %v1652_v57 = vld [vmem:[%s2274_s13 + $0xc8] sm:$0xf0] }
  0x71   : > { %1802 = vmatpush.bf16.msra.mxu3 %v2290_v2  ;;  %895 = vmatmul.bf16.gmra.mxu1 %v1379_v58  ;;  %v1394_v2 = vld [vmem:[%s2274_s13 + $0x50] sm:$0xf]  ;;  %v1651_v58 = vld [vmem:[%s2274_s13 + $0xc4] sm:$0xf] }
  0x72   : > { %979 = vmatmul.bf16.gmra.mxu2 %v1383_v59  ;;  %v1395_v7 = vor.u32 %v1638_v3, %v1394_v2  ;;  %v1526_v59 = vld [vmem:[%s2274_s13 + $0x158] sm:$0xf]  ;;  %v1451_v3 = vor.u32 %v1651_v58, %v1448_v61 }
  0x73   : > { %v1527_v1 = vor.u32 %v1671_v60, %v1526_v59 }
  0x75   : > { %1803 = vmatpush.bf16.msra.mxu3 %v2296_v5  ;;  %v1499_v5 = vor.u32 %v1663_v63, %v1496_v0  ;;  %v1653_v63 = vld [vmem:[%s2274_s13 + $0xd0] sm:$0xf0]  ;;  %v1447_v0 = vor.u32 %v1652_v57, %v1446_v56  ;;  %v1479_v56 = vor.u32 %v1659_v47, %v1478_v46 }
  0x79   : > { %1804 = vmatpush.bf16.msra.mxu3 %v2300_v8  ;;  %v1398_v8 = vld [vmem:[%s2274_s13 + $0x60] sm:$0xf] }
  0x7a   : > { %v1399_v16 = vor.u32 %v1640_v9, %v1398_v8 }
  0x7d   : > { %1805 = vmatpush.bf16.msra.mxu3 %v2303_v11  ;;  %v1666_v11 = vld [vmem:[%s2274_s13 + $0x13c] sm:$0xf] }
  0x80   : > { %816 = vmatmul.bf16.gmra.mxu0 %v1387_v4  ;;  %945 = vmatmul.bf16.vlgmr.msrb.gmra.mxu3 %v1499_v5  ;;  %v1455_v4 = vor.u32 %v1653_v63, %v1454_v62 }
  0x81   : > { %1806 = vmatpush.bf16.msra.mxu3 %v2306_v14  ;;  %900 = vmatmul.bf16.gmra.mxu1 %v1391_v6  ;;  %v1406_v14 = vld [vmem:[%s2274_s13 + $0x68] sm:$0xf] }
  0x82   : > { %984 = vmatmul.bf16.gmra.mxu2 %v1395_v7  ;;  %v1407_v19 = vor.u32 %v1641_v15, %v1406_v14  ;;  %v1655_v14 = vld [vmem:[%s2274_s13 + $0xe0] sm:$0xf0]  ;;  %v1654_v15 = vld [vmem:[%s2274_s13 + $0xdc] sm:$0xf] }
  0x83   : > { %v1459_v25 = vor.u32 %v1655_v14, %v1458_v13  ;;  %v1662_v13 = vld [vmem:[%s2274_s13 + $0x118] sm:$0xf0] }
  0x85   : > { %1807 = vmatpush.bf16.msra.mxu3 %v2309_v17  ;;  %v1511_v17 = vor.u32 %v1666_v11, %v1508_v12  ;;  %v2402_v12 = vld [vmem:[#allocation7] ss:$0 sm:$0xff] }
  0x89   : > { %1808 = vmatpush.bf16.msra.mxu3 %v2312_v20  ;;  %v1410_v20 = vld [vmem:[%s2274_s13 + $0x78] sm:$0xf] }
  0x8a   : > { %v1411_v28 = vor.u32 %v1643_v21, %v1410_v20  ;;  %v2411_v20 = vld [vmem:[#allocation8] ss:$0 sm:$0xff] }
  0x8d   : > { %1809 = vmatpush.bf16.msra.mxu3 %v2314_v23  ;;  %v1412_v23 = vld [vmem:[%s2274_s13 + $0x84] sm:$0xf0] }
  0x8e   : > { %v1415_v30 = vor.u32 %v1642_v22, %v1412_v23 }
  0x90   : > { %821 = vmatmul.bf16.gmra.mxu0 %v1399_v16  ;;  %950 = vmatmul.bf16.gmra.mxu3 %v1511_v17  ;;  %v1460_v16 = vld [vmem:[%s2274_s13 + $0xe4] sm:$0xf0]  ;;  %v1466_v17 = vld [vmem:[%s2274_s13 + $0xe0] sm:$0xf] }
  0x91   : > { %905 = vmatmul.bf16.gmra.mxu1 %v1403_v18  ;;  %v1656_v18 = vld [vmem:[%s2274_s13 + $0xe8] sm:$0xf0]  ;;  %v1463_v27 = vor.u32 %v1654_v15, %v1460_v16 }
  0x92   : > { %989 = vmatmul.bf16.gmra.mxu2 %v1407_v19 }
  0xa0   : > { %826 = vmatmul.bf16.gmra.mxu0 %v1411_v28  ;;  %955 = vmatmul.bf16.gmra.mxu3 %v1523_v29  ;;  %v1467_v28 = vor.u32 %v1656_v18, %v1466_v17 }
  0xa1   : > { %910 = vmatmul.bf16.gmra.mxu1 %v1415_v30 }
  0xa2   : > { %994 = vmatmul.bf16.gmra.mxu2 %v1419_v31 }
  0xb0   : > { %831 = vmatmul.bf16.gmra.mxu0 %v1423_v40  ;;  %1029 = vmatmul.bf16.vlgmr.msra.gmra.mxu3 %v1503_v41 }
  0xb1   : > { %915 = vmatmul.bf16.gmra.mxu1 %v1427_v42  ;;  %v1470_v42 = vld [vmem:[%s2274_s13 + $0xf0] sm:$0xf] }
  0xb2   : > { %999 = vmatmul.bf16.gmra.mxu2 %v1431_v43  ;;  %v1658_v43 = vld [vmem:[%s2274_s13 + $0xf8] sm:$0xf0] }
  0xc0   : > { %836 = vmatmul.bf16.gmra.mxu0 %v1435_v52  ;;  %1034 = vmatmul.bf16.gmra.mxu3 %v1515_v53  ;;  %v1471_v52 = vor.u32 %v1658_v43, %v1470_v42 }
  0xc1   : > { %920 = vmatmul.bf16.gmra.mxu1 %v1439_v54 }
  0xc2   : > { %1004 = vmatmul.bf16.gmra.mxu2 %v1443_v55  ;;  %v1475_v55 = vor.u32 %v1657_v44, %v1472_v45 }
  0xcd   : > { %v802_v2 = vpop.f32.mrf.mxu0 }
  0xce   : > { %v886_v5 = vpop.f32.mrf.mxu1 }
  0xcf   : > { %v887_v6 = vadd.f32 %v886_v5, %v802_v2 }
  0xd0   : > { %841 = vmatmul.bf16.gmra.mxu0 %v1447_v0  ;;  %1039 = vmatmul.bf16.gmra.mxu3 %v1527_v1 }
  0xd1   : > { %925 = vmatmul.bf16.gmra.mxu1 %v1451_v3 }
  0xd2   : > { %1009 = vmatmul.bf16.gmra.mxu2 %v1455_v4 }
  0xd3   : > { %v2400_v7 = vpop.f32.mrf.mxu3 }
  0xd5   : > { %v970_v8 = vpop.f32.mrf.mxu2  ;;  %v804_v9 = vpop.f32.mrf.mxu0 }
  0xd6   : > { %v888_v10 = vpop.f32.mrf.mxu1  ;;  %v971_v11 = vadd.f32 %v970_v8, %v887_v6  ;;  %v1482_v6 = vld [vmem:[%s2274_s13 + $0x108] sm:$0xf]  ;;  %v1661_v8 = vld [vmem:[%s2274_s13 + $0x110] sm:$0xf0] }
  0xd7   : > { %v889_v21 = vadd.f32 %v888_v10, %v804_v9  ;;  %v1660_v9 = vld [vmem:[%s2274_s13 + $0x10c] sm:$0xf]  ;;  %v1484_v10 = vld [vmem:[%s2274_s13 + $0x114] sm:$0xf0]  ;;  %v1483_v18 = vor.u32 %v1661_v8, %v1482_v6 }
  0xd8   : > { %v1049_v19 = vmul.f32 %v2402_v12, %v971_v11  ;;  %v1490_v11 = vld [vmem:[%s2274_s13 + $0x110] sm:$0xf] }
  0xda   : > { %v1083_v30 = vadd.f32 %v2411_v20, %v1049_v19 }
  0xdb   : > { %v2413_v22 = vpop.f32.mrf.mxu3 }
  0xdc   : > { %v1113_v33 = vmax.f32 %v1083_v30, 0.0 }
  0xdd   : > { %v972_v24 = vpop.f32.mrf.mxu2  ;;  %v807_v26 = vpop.f32.mrf.mxu0 }
  0xde   : > { %v973_v23 = vadd.f32 %v972_v24, %v889_v21  ;;  %v891_v29 = vpop.f32.mrf.mxu1  ;;  %v1487_v24 = vor.u32 %v1660_v9, %v1484_v10 }
  0xdf   : > { %v892_v35 = vadd.f32 %v891_v29, %v807_v26 }
  0xe0   : > { %v1050_v31 = vmul.f32 %v2402_v12, %v973_v23  ;;  %846 = vmatmul.bf16.gmra.mxu0 %v1459_v25  ;;  %v1491_v25 = vor.u32 %v1662_v13, %v1490_v11 }
  0xe1   : > { %930 = vmatmul.bf16.gmra.mxu1 %v1463_v27 }
  0xe2   : > { %v1084_v32 = vadd.f32 %v2411_v20, %v1050_v31  ;;  %1014 = vmatmul.bf16.gmra.mxu2 %v1467_v28 }
  0xe3   : > { %v2419_v36 = vpop.f32.mrf.mxu3 }
  0xe4   : > { %v1114_v34 = vmax.f32 %v1084_v32, 0.0 }
  0xe5   : > { %v975_v37 = vpop.f32.mrf.mxu2  ;;  %v809_v39 = vpop.f32.mrf.mxu0 }
  0xe6   : > { %v1700_v38 = vpack.c.bf16 %v1114_v34, %v1113_v33  ;;  %v893_v40 = vpop.f32.mrf.mxu1  ;;  %v976_v41 = vadd.f32 %v975_v37, %v892_v35 }
  0xe7   : > { %v894_v49 = vadd.f32 %v893_v40, %v809_v39 }
  0xe8   : > { %1701 = vst [vmem:[%s2421_s23] sm:$0xff] %v1700_v38   ;;  %v1051_v48 = vmul.f32 %v2402_v12, %v976_v41 }
  0xea   : > { %v1085_v58 = vadd.f32 %v2411_v20, %v1051_v48 }
  0xeb   : > { %v2431_v50 = vpop.f32.mrf.mxu3 }
  0xec   : > { %v1115_v61 = vmax.f32 %v1085_v58, 0.0 }
  0xed   : > { %v977_v51 = vpop.f32.mrf.mxu2  ;;  %v812_v54 = vpop.f32.mrf.mxu0 }
  0xee   : > { %v978_v53 = vadd.f32 %v977_v51, %v894_v49  ;;  %v896_v57 = vpop.f32.mrf.mxu1 }
  0xef   : > { %v897_v63 = vadd.f32 %v896_v57, %v812_v54 }
  0xf0   : > { %v1052_v59 = vmul.f32 %v2402_v12, %v978_v53  ;;  %851 = vmatmul.bf16.gmra.mxu0 %v1471_v52 }
  0xf1   : > { %935 = vmatmul.bf16.gmra.mxu1 %v1475_v55 }
  0xf2   : > { %v1086_v60 = vadd.f32 %v2411_v20, %v1052_v59  ;;  %1019 = vmatmul.bf16.gmra.mxu2 %v1479_v56 }
  0xf3   : > { %v2436_v0 = vpop.f32.mrf.mxu3 }
  0xf4   : > { %v1116_v62 = vmax.f32 %v1086_v60, 0.0 }
  0xf5   : > { %v980_v1 = vpop.f32.mrf.mxu2  ;;  %v814_v3 = vpop.f32.mrf.mxu0 }
  0xf6   : > { %v1705_v2 = vpack.c.bf16 %v1116_v62, %v1115_v61  ;;  %v898_v4 = vpop.f32.mrf.mxu1  ;;  %v981_v5 = vadd.f32 %v980_v1, %v897_v63 }
  0xf7   : > { %v899_v15 = vadd.f32 %v898_v4, %v814_v3 }
  0xf8   : > { %1772 = vst [vmem:[%s2421_s23 + $0x8] sm:$0xff] %v1705_v2   ;;  %v1053_v14 = vmul.f32 %v2402_v12, %v981_v5 }
  0xfa   : > { %v1087_v26 = vadd.f32 %v2411_v20, %v1053_v14 }
  0xfb   : > { %v2446_v16 = vpop.f32.mrf.mxu3 }
  0xfc   : > { %v1117_v29 = vmax.f32 %v1087_v26, 0.0 }
  0xfd   : > { %v982_v17 = vpop.f32.mrf.mxu2  ;;  %v817_v21 = vpop.f32.mrf.mxu0 }
  0xfe   : > { %v983_v19 = vadd.f32 %v982_v17, %v899_v15  ;;  %v901_v23 = vpop.f32.mrf.mxu1 }
  0xff   : > { %v902_v31 = vadd.f32 %v901_v23, %v817_v21 }
 0x100   : > { %v1054_v27 = vmul.f32 %v2402_v12, %v983_v19  ;;  %856 = vmatmul.bf16.gmra.mxu0 %v1483_v18 }
 0x101   : > { %940 = vmatmul.bf16.gmra.mxu1 %v1487_v24 }
 0x102   : > { %v1088_v28 = vadd.f32 %v2411_v20, %v1054_v27  ;;  %1024 = vmatmul.bf16.gmra.mxu2 %v1491_v25 }
 0x103   : > { %v946_v32 = vpop.f32.mrf.mxu3 }
 0x104   : > { %v1118_v30 = vmax.f32 %v1088_v28, 0.0 }
 0x105   : > { %v985_v33 = vpop.f32.mrf.mxu2  ;;  %v819_v35 = vpop.f32.mrf.mxu0 }
 0x106   : > { %v1710_v34 = vpack.c.bf16 %v1118_v30, %v1117_v29  ;;  %v903_v37 = vpop.f32.mrf.mxu1  ;;  %v986_v38 = vadd.f32 %v985_v33, %v902_v31 }
 0x107   : > { %v904_v40 = vadd.f32 %v903_v37, %v819_v35  ;;  %v947_v35 = vadd.f32 %v946_v32, %v2400_v7 }
 0x108   : > { %1773 = vst [vmem:[%s2421_s23 + $0x10] sm:$0xff] %v1710_v34   ;;  %v1055_v39 = vmul.f32 %v2402_v12, %v986_v38 }
 0x10a   : > { %v1089_v46 = vadd.f32 %v2411_v20, %v1055_v39 }
 0x10b   : > { %v948_v41 = vpop.f32.mrf.mxu3 }
 0x10c   : > { %v1119_v49 = vmax.f32 %v1089_v46, 0.0 }
 0x10d   : > { %v987_v42 = vpop.f32.mrf.mxu2  ;;  %v822_v44 = vpop.f32.mrf.mxu0 }
 0x10e   : > { %v988_v43 = vadd.f32 %v987_v42, %v904_v40  ;;  %v906_v45 = vpop.f32.mrf.mxu1 }
 0x10f   : > { %v907_v52 = vadd.f32 %v906_v45, %v822_v44  ;;  %v949_v44 = vadd.f32 %v948_v41, %v2413_v22 }
 0x110   : > { %v1056_v47 = vmul.f32 %v2402_v12, %v988_v43 }
 0x112   : > { %v1090_v48 = vadd.f32 %v2411_v20, %v1056_v47 }
 0x113   : > { %v2456_v53 = vpop.f32.mrf.mxu3 }
 0x114   : > { %v1120_v51 = vmax.f32 %v1090_v48, 0.0 }
 0x115   : > { %v990_v54 = vpop.f32.mrf.mxu2  ;;  %v824_v56 = vpop.f32.mrf.mxu0 }
 0x116   : > { %v1715_v55 = vpack.c.bf16 %v1120_v51, %v1119_v49  ;;  %v908_v57 = vpop.f32.mrf.mxu1  ;;  %v991_v58 = vadd.f32 %v990_v54, %v907_v52 }
 0x117   : > { %v909_v60 = vadd.f32 %v908_v57, %v824_v56 }
 0x118   : > { %1774 = vst [vmem:[%s2421_s23 + $0x18] sm:$0xff] %v1715_v55   ;;  %v1057_v59 = vmul.f32 %v2402_v12, %v991_v58 }
 0x11a   : > { %v1091_v3 = vadd.f32 %v2411_v20, %v1057_v59 }
 0x11b   : > { %v2460_v61 = vpop.f32.mrf.mxu3 }
 0x11c   : > { %v1121_v6 = vmax.f32 %v1091_v3, 0.0 }
 0x11d   : > { %v992_v62 = vpop.f32.mrf.mxu2  ;;  %v827_v1 = vpop.f32.mrf.mxu0 }
 0x11e   : > { %v993_v63 = vadd.f32 %v992_v62, %v909_v60  ;;  %v911_v2 = vpop.f32.mrf.mxu1 }
 0x11f   : > { %v912_v9 = vadd.f32 %v911_v2, %v827_v1  ;;  %v952_v2 = vadd.f32 %v2456_v53, %v2419_v36 }
 0x120   : > { %v1058_v4 = vmul.f32 %v2402_v12, %v993_v63 }
 0x122   : > { %v1092_v5 = vadd.f32 %v2411_v20, %v1058_v4 }
 0x123   : > { %v2465_v10 = vpop.f32.mrf.mxu3 }
 0x124   : > { %v1122_v8 = vmax.f32 %v1092_v5, 0.0 }
 0x125   : > { %v995_v11 = vpop.f32.mrf.mxu2  ;;  %v829_v14 = vpop.f32.mrf.mxu0 }
 0x126   : > { %v1720_v13 = vpack.c.bf16 %v1122_v8, %v1121_v6  ;;  %v913_v15 = vpop.f32.mrf.mxu1  ;;  %v996_v17 = vadd.f32 %v995_v11, %v912_v9 }
 0x127   : > { %v914_v19 = vadd.f32 %v913_v15, %v829_v14 }
 0x128   : > { %1775 = vst [vmem:[%s2421_s23 + $0x20] sm:$0xff] %v1720_v13   ;;  %v1059_v18 = vmul.f32 %v2402_v12, %v996_v17  ;;  %v954_v13 = vadd.f32 %v2460_v61, %v2431_v50 }
 0x12a   : > { %v1093_v27 = vadd.f32 %v2411_v20, %v1059_v18 }
 0x12b   : > { %v2469_v21 = vpop.f32.mrf.mxu3 }
 0x12c   : > { %v1123_v30 = vmax.f32 %v1093_v27, 0.0 }
 0x12d   : > { %v997_v24 = vpop.f32.mrf.mxu2  ;;  %v832_v23 = vpop.f32.mrf.mxu0 }
 0x12e   : > { %v998_v25 = vadd.f32 %v997_v24, %v914_v19  ;;  %v916_v26 = vpop.f32.mrf.mxu1 }
 0x12f   : > { %v917_v33 = vadd.f32 %v916_v26, %v832_v23 }
 0x130   : > { %v1060_v28 = vmul.f32 %v2402_v12, %v998_v25 }
 0x132   : > { %v1094_v29 = vadd.f32 %v2411_v20, %v1060_v28 }
 0x133   : > { %v1030_v34 = vpop.f32.mrf.mxu3 }
 0x134   : > { %v1124_v31 = vmax.f32 %v1094_v29, 0.0  ;;  %v1031_v40 = vadd.f32 %v1030_v34, %v947_v35 }
 0x135   : > { %v1000_v37 = vpop.f32.mrf.mxu2  ;;  %v834_v39 = vpop.f32.mrf.mxu0 }
 0x136   : > { %v1725_v38 = vpack.c.bf16 %v1124_v31, %v1123_v30  ;;  %v918_v42 = vpop.f32.mrf.mxu1  ;;  %v1001_v43 = vadd.f32 %v1000_v37, %v917_v33  ;;  %v1073_v45 = vmul.f32 %v2402_v12, %v1031_v40  ;;  %v957_v37 = vadd.f32 %v2465_v10, %v2436_v0 }
 0x137   : > { %v919_v47 = vadd.f32 %v918_v42, %v834_v39 }
 0x138   : > { %1776 = vst [vmem:[%s2421_s23 + $0x28] sm:$0xff] %v1725_v38   ;;  %v1061_v46 = vmul.f32 %v2402_v12, %v1001_v43  ;;  %v1107_v7 = vadd.f32 %v2411_v20, %v1073_v45 }
 0x13a   : > { %v1095_v56 = vadd.f32 %v2411_v20, %v1061_v46  ;;  %v1137_v58 = vmax.f32 %v1107_v7, 0.0  ;;  %v959_v46 = vadd.f32 %v2469_v21, %v2446_v16 }
 0x13b   : > { %v1032_v48 = vpop.f32.mrf.mxu3 }
 0x13c   : > { %v1033_v51 = vadd.f32 %v1032_v48, %v949_v44  ;;  %v1125_v60 = vmax.f32 %v1095_v56, 0.0 }
 0x13d   : > { %v1002_v49 = vpop.f32.mrf.mxu2  ;;  %v837_v54 = vpop.f32.mrf.mxu0 }
 0x13e   : > { %v1003_v52 = vadd.f32 %v1002_v49, %v919_v47  ;;  %v1074_v32 = vmul.f32 %v2402_v12, %v1033_v51  ;;  %v921_v55 = vpop.f32.mrf.mxu1 }
 0x13f   : > { %v922_v63 = vadd.f32 %v921_v55, %v837_v54 }
 0x140   : > { %v1062_v22 = vmul.f32 %v2402_v12, %v1003_v52  ;;  %v1108_v41 = vadd.f32 %v2411_v20, %v1074_v32 }
 0x142   : > { %v1096_v57 = vadd.f32 %v2411_v20, %v1062_v22  ;;  %v1138_v59 = vmax.f32 %v1108_v41, 0.0 }
 0x143   : > { %v1035_v1 = vpop.f32.mrf.mxu3 }
 0x144   : > { %v1126_v62 = vmax.f32 %v1096_v57, 0.0  ;;  %v1760_v3 = vpack.c.bf16 %v1138_v59, %v1137_v58  ;;  %v1036_v8 = vadd.f32 %v1035_v1, %v952_v2 }
 0x145   : > { %v1005_v4 = vpop.f32.mrf.mxu2  ;;  %v839_v6 = vpop.f32.mrf.mxu0 }
 0x146   : > { %v1730_v5 = vpack.c.bf16 %v1126_v62, %v1125_v60  ;;  %1783 = vst [vmem:[%s2421_s23 + $0x60] sm:$0xff] %v1760_v3   ;;  %v923_v9 = vpop.f32.mrf.mxu1  ;;  %v1006_v11 = vadd.f32 %v1005_v4, %v922_v63  ;;  %v1075_v14 = vmul.f32 %v2402_v12, %v1036_v8 }
 0x147   : > { %v924_v17 = vadd.f32 %v923_v9, %v839_v6 }
 0x148   : > { %1777 = vst [vmem:[%s2421_s23 + $0x30] sm:$0xff] %v1730_v5   ;;  %v1063_v15 = vmul.f32 %v2402_v12, %v1006_v11  ;;  %v1109_v25 = vadd.f32 %v2411_v20, %v1075_v14 }
 0x14a   : > { %v1097_v27 = vadd.f32 %v2411_v20, %v1063_v15  ;;  %v1139_v29 = vmax.f32 %v1109_v25, 0.0 }
 0x14b   : > { %v1037_v18 = vpop.f32.mrf.mxu3 }
 0x14c   : > { %v1038_v36 = vadd.f32 %v1037_v18, %v954_v13  ;;  %v1127_v31 = vmax.f32 %v1097_v27, 0.0 }
 0x14d   : > { %v1007_v19 = vpop.f32.mrf.mxu2  ;;  %v842_v24 = vpop.f32.mrf.mxu0 }
 0x14e   : > { %v1008_v53 = vadd.f32 %v1007_v19, %v924_v17  ;;  %v1076_v23 = vmul.f32 %v2402_v12, %v1038_v36  ;;  %v926_v26 = vpop.f32.mrf.mxu1 }
 0x14f   : > { %v927_v34 = vadd.f32 %v926_v26, %v842_v24 }
 0x150   : > { %v1064_v50 = vmul.f32 %v2402_v12, %v1008_v53  ;;  %v1110_v61 = vadd.f32 %v2411_v20, %v1076_v23 }
 0x152   : > { %v1098_v28 = vadd.f32 %v2411_v20, %v1064_v50  ;;  %v1140_v30 = vmax.f32 %v1110_v61, 0.0 }
 0x153   : > { %v1040_v35 = vpop.f32.mrf.mxu3 }
 0x154   : > { %v1128_v33 = vmax.f32 %v1098_v28, 0.0  ;;  %v1765_v38 = vpack.c.bf16 %v1140_v30, %v1139_v29  ;;  %v1041_v43 = vadd.f32 %v1040_v35, %v957_v37 }
 0x155   : > { %v1010_v39 = vpop.f32.mrf.mxu2  ;;  %v844_v42 = vpop.f32.mrf.mxu0 }
 0x156   : > { %v1735_v40 = vpack.c.bf16 %v1128_v33, %v1127_v31  ;;  %1784 = vst [vmem:[%s2421_s23 + $0x68] sm:$0xff] %v1765_v38   ;;  %v928_v44 = vpop.f32.mrf.mxu1  ;;  %v1011_v45 = vadd.f32 %v1010_v39, %v927_v34  ;;  %v1077_v47 = vmul.f32 %v2402_v12, %v1041_v43 }
 0x157   : > { %v929_v49 = vadd.f32 %v928_v44, %v844_v42 }
 0x158   : > { %1778 = vst [vmem:[%s2421_s23 + $0x38] sm:$0xff] %v1735_v40   ;;  %v1065_v48 = vmul.f32 %v2402_v12, %v1011_v45  ;;  %v1111_v7 = vadd.f32 %v2411_v20, %v1077_v47 }
 0x15a   : > { %v1099_v56 = vadd.f32 %v2411_v20, %v1065_v48  ;;  %v1141_v41 = vmax.f32 %v1111_v7, 0.0 }
 0x15b   : > { %v1042_v51 = vpop.f32.mrf.mxu3 }
 0x15c   : > { %v1043_v0 = vadd.f32 %v1042_v51, %v959_v46  ;;  %v1129_v58 = vmax.f32 %v1099_v56, 0.0 }
 0x15d   : > { %v1012_v52 = vpop.f32.mrf.mxu2  ;;  %v847_v54 = vpop.f32.mrf.mxu0 }
 0x15e   : > { %v1013_v10 = vadd.f32 %v1012_v52, %v929_v49  ;;  %v1078_v32 = vmul.f32 %v2402_v12, %v1043_v0  ;;  %v931_v55 = vpop.f32.mrf.mxu1 }
 0x15f   : > { %v932_v60 = vadd.f32 %v931_v55, %v847_v54 }
 0x160   : > { %v1066_v16 = vmul.f32 %v2402_v12, %v1013_v10  ;;  %v1112_v21 = vadd.f32 %v2411_v20, %v1078_v32 }
 0x162   : > { %v1100_v22 = vadd.f32 %v2411_v20, %v1066_v16  ;;  %v1142_v57 = vmax.f32 %v1112_v21, 0.0 }
 0x164   : > { %v1130_v59 = vmax.f32 %v1100_v22, 0.0  ;;  %v1770_v62 = vpack.c.bf16 %v1142_v57, %v1141_v41 }
 0x165   : > { %v1015_v63 = vpop.f32.mrf.mxu2  ;;  %v849_v2 = vpop.f32.mrf.mxu0 }
 0x166   : > { %v1740_v1 = vpack.c.bf16 %v1130_v59, %v1129_v58  ;;  %1785 = vst [vmem:[%s2421_s23 + $0x70] sm:$0xff] %v1770_v62   ;;  %v933_v3 = vpop.f32.mrf.mxu1  ;;  %v1016_v4 = vadd.f32 %v1015_v63, %v932_v60 }
 0x167   : > { %v934_v6 = vadd.f32 %v933_v3, %v849_v2 }
 0x168   : > { %1779 = vst [vmem:[%s2421_s23 + $0x40] sm:$0xff] %v1740_v1   ;;  %v1067_v5 = vmul.f32 %v2402_v12, %v1016_v4 }
 0x16a   : > { %v1101_v14 = vadd.f32 %v2411_v20, %v1067_v5 }
 0x16c   : > { %v1131_v18 = vmax.f32 %v1101_v14, 0.0 }
 0x16d   : > { %v1017_v8 = vpop.f32.mrf.mxu2  ;;  %v852_v11 = vpop.f32.mrf.mxu0 }
 0x16e   : > { %v1018_v9 = vadd.f32 %v1017_v8, %v934_v6  ;;  %v936_v13 = vpop.f32.mrf.mxu1 }
 0x16f   : > { %v937_v36 = vadd.f32 %v936_v13, %v852_v11 }
 0x170   : > { %v1068_v15 = vmul.f32 %v2402_v12, %v1018_v9 }
 0x172   : > { %v1102_v17 = vadd.f32 %v2411_v20, %v1068_v15 }
 0x174   : > { %v1132_v19 = vmax.f32 %v1102_v17, 0.0 }
 0x175   : > { %v1020_v53 = vpop.f32.mrf.mxu2  ;;  %v854_v25 = vpop.f32.mrf.mxu0 }
 0x176   : > { %v1745_v24 = vpack.c.bf16 %v1132_v19, %v1131_v18  ;;  %v938_v23 = vpop.f32.mrf.mxu1  ;;  %v1021_v26 = vadd.f32 %v1020_v53, %v937_v36 }
 0x177   : > { %v939_v50 = vadd.f32 %v938_v23, %v854_v25 }
 0x178   : > { %1780 = vst [vmem:[%s2421_s23 + $0x48] sm:$0xff] %v1745_v24   ;;  %v1069_v27 = vmul.f32 %v2402_v12, %v1021_v26 }
 0x17a   : > { %v1103_v31 = vadd.f32 %v2411_v20, %v1069_v27 }
 0x17c   : > { %v1133_v35 = vmax.f32 %v1103_v31, 0.0 }
 0x17d   : > { %v1022_v61 = vpop.f32.mrf.mxu2  ;;  %v857_v29 = vpop.f32.mrf.mxu0 }
 0x17e   : > { %v1023_v28 = vadd.f32 %v1022_v61, %v939_v50  ;;  %v941_v30 = vpop.f32.mrf.mxu1 }
 0x17f   : > { %v942_v38 = vadd.f32 %v941_v30, %v857_v29 }
 0x180   : > { %v1070_v33 = vmul.f32 %v2402_v12, %v1023_v28 }
 0x182   : > { %v1104_v34 = vadd.f32 %v2411_v20, %v1070_v33 }
 0x184   : > { %v1134_v37 = vmax.f32 %v1104_v34, 0.0 }
 0x185   : > { %v1025_v39 = vpop.f32.mrf.mxu2  ;;  %v859_v43 = vpop.f32.mrf.mxu0 }
 0x186   : > { %v1750_v40 = vpack.c.bf16 %v1134_v37, %v1133_v35  ;;  %v1026_v42 = vadd.f32 %v1025_v39, %v942_v38  ;;  %v943_v44 = vpop.f32.mrf.mxu1 }
 0x187   : > { %v944_v46 = vadd.f32 %v943_v44, %v859_v43 }
 0x188   : > { %1781 = vst [vmem:[%s2421_s23 + $0x50] sm:$0xff] %v1750_v40   ;;  %v1071_v45 = vmul.f32 %v2402_v12, %v1026_v42 }
 0x18a   : > { %v1105_v49 = vadd.f32 %v2411_v20, %v1071_v45 }
 0x18c   : > { %v1135_v0 = vmax.f32 %v1105_v49, 0.0 }
 0x18d   : > { %v1027_v47 = vpop.f32.mrf.mxu2 }
 0x18e   : > { %v1028_v48 = vadd.f32 %v1027_v47, %v944_v46 }
 0x190   : > { %v1072_v51 = vmul.f32 %v2402_v12, %v1028_v48 }
 0x192   : > { %v1106_v52 = vadd.f32 %v2411_v20, %v1072_v51 }
 0x194   : > { %v1136_v10 = vmax.f32 %v1106_v52, 0.0 }
 0x196   : > { %v1755_v54 = vpack.c.bf16 %v1136_v10, %v1135_v0 }
 0x198   : > { %1782 = vst [vmem:[%s2421_s23 + $0x58] sm:$0xff] %v1755_v54  }
 0x199   : > { %2063 = shalt.err (!%p2060_p12)
}
 0x19a   : > { %s2135_s6 = smov 64   ;;  %s2136_s13 = smov 4  }
 0x19b   : > { %1828 = dma.vmem_to_hbm [thread:$0]  (%p2252_p3), %s1218_s14, 1920, %s1220_s18, %s1204_s21, %s2135_s6, %s2135_s6, %s2136_s13  }
 0x19c PF: > { %p1856_p13 = scmp.ge.s32.totalorder %s2126_s20, 2  ;;  %s1234_s1 = sand.u32 1, %s2106_s15  }
 0x19d   : > { %s1235_s23 = scalar_lea.sflag [#allocation4], %s1234_s1 }
 0x19e   : > { %p1845_p0 = pnand %p1856_p13, %p2211_p6 }
 0x1a0   : > { %p1846_p5 = pneg %p1845_p0 }
 0x1a2   : > { %2101 = dma.done.wait (%p1846_p5), %s1235_s23, 1920  }
 0x1a3   : > { %2103 = vsyncadd (%p1846_p5), %s1235_s23, 4294965376  ;;  %s22_s20 = sadd.s32 1, %s2126_s20   ;;  %s2582_s15 = smov %s2110_s16 }
 0x1a4   : > { %p19_p7 = scmp.ge.s32.totalorder %s22_s20, 10   ;;  %s2583_s16 = smov %s2114_s17 }
 0x1a5   : > { %s2584_s17 = smov %s2261_s11  ;;  %s2585_s18 = smov %s2122_s19 }
 0x1a6   : > { %s2586_s19 = smov %s2588_s29  ;;  %21 = sbr.rel (!%p19_p7) target bundleno = 10 (0xa), region = 96 }
 0x1ab   :  { %1241 = vsyncpa [#allocation3], 1 }
 0x1ac   :  { %1243 = vsyncpa [#allocation3 + $0x1], 1 }
 0x1ad   :  { %1244 = vsyncpa [#allocation6], 1 }
 0x1ae   :  { %1245 = vsyncpa [#allocation9], 1 }
 0x1af   :  { %1246 = vsyncpa [#allocation4], 1 }
 0x1b0   :  { %1248 = vsyncpa [#allocation4 + $0x1], 1 }

</bundles_post_ra>
